<compile_context>
chip_gen: v6e
topology: v6e:2x2x1
jax: 0.10.0
libtpu: 0.0.40
codegen_flags: <defaults>
</compile_context>

<pallas_src>
import functools
import math

import jax
import jax.numpy as jnp
from jax import lax
from jax.experimental import pallas as pl
from jax.experimental.pallas import tpu as pltpu

_LANES = 128      # vreg lane width: keep the last dim lane-dense
_ROW_ALIGN = 16   # sublane alignment safe for both f32 (8) and bf16 (16)


def _round_up(x, m):
    return ((x + m - 1) // m) * m


def _cdiv(a, b):
    return -(-a // b)


def _is_static_scalar(x):
    return isinstance(x, (int, float)) and not isinstance(x, bool)


def _to_rows_lanes(x):
    """Flatten to a lane-dense [rows, 128] layout, padding only the 128-tail."""
    total = int(math.prod(x.shape)) if x.ndim else 1
    rows = _cdiv(total, _LANES)
    padded = rows * _LANES != total
    flat = x.reshape(-1)
    if padded:
        flat = jnp.pad(flat, (0, rows * _LANES - total))
    return flat.reshape(rows, _LANES), rows, total, padded


def _pick_block(rows, block_rows, itemsize, n_streams):
    """Pick row-tile size, grid length and an explicit VMEM limit."""
    if block_rows is None:
        # ~2 MiB / stream / buffer for f32, same byte footprint for bf16.
        block_rows = 4096 if itemsize >= 4 else 8192
    tb = _round_up(block_rows, _ROW_ALIGN)
    # Guarantee >= 2 grid steps for mid-size tensors so v7x megacore sharding
    # (dimension_semantics="parallel") can use both TensorCores.
    if rows >= 2 * _ROW_ALIGN:
        tb = min(tb, _round_up(_cdiv(rows, 2), _ROW_ALIGN))
    tb = min(tb, rows)
    grid_len = _cdiv(rows, tb)
    # Double-buffered footprint + 2 MiB margin; never below the 32 MiB scoped
    # default (v5e's default is only 16 MiB, so we must raise it explicitly).
    need = n_streams * 2 * tb * _LANES * itemsize + (2 << 20)
    vmem_limit = max(32 << 20, need)
    return tb, grid_len, vmem_limit


# ---------------------------------------------------------------------------
# Elementwise kernel (exact forward semantics of the two loss functions).
# ---------------------------------------------------------------------------
def _elementwise_kernel(*refs, static_scalars, compute_fixed, compute_learned):
    if static_scalars is None:
        scalars_ref = refs[0]
        refs = refs[1:]
        beta = scalars_ref[0]
        exp_neg_sx = scalars_ref[1]
        exp_neg_sq = scalars_ref[2]
        sx_plus_sq = scalars_ref[3]
    else:
        beta, exp_neg_sx, exp_neg_sq, sx_plus_sq = static_scalars

    lpos_ref, lrot_ref = refs[0], refs[1]
    out_refs = refs[2:]

    # Cast in-register; inputs stream in their native dtype.
    lp = lpos_ref[...].astype(jnp.float32)
    lr = lrot_ref[...].astype(jnp.float32)

    i = 0
    if compute_fixed:
        out_refs[i][...] = (lp + beta * lr).astype(out_refs[i].dtype)
        i += 1
    if compute_learned:
        out_refs[i][...] = (exp_neg_sx * lp + exp_neg_sq * lr
                            + sx_plus_sq).astype(out_refs[i].dtype)


def basenet_weighted_losses(loss_pos, loss_rot, sx, sq, beta=1.0,
                            block_rows=None, compute_fixed=True,
                            compute_learned=True):
    """Elementwise fixed/learned weighted losses (same shape/dtype as inputs).

    Returns (fixed, learned) when both are requested, otherwise the single
    requested array.
    """
    assert compute_fixed or compute_learned, "request at least one output"
    assert loss_pos.shape == loss_rot.shape, "loss_pos / loss_rot shape mismatch"
    assert loss_pos.dtype == loss_rot.dtype, "loss_pos / loss_rot dtype mismatch"
    orig_shape = loss_pos.shape
    dtype = loss_pos.dtype

    lp2, rows, total, padded = _to_rows_lanes(loss_pos)
    lr2, _, _, _ = _to_rows_lanes(loss_rot)

    n_out = int(compute_fixed) + int(compute_learned)
    itemsize = jnp.dtype(dtype).itemsize
    tb, grid_len, vmem_limit = _pick_block(rows, block_rows, itemsize, 2 + n_out)

    static = all(_is_static_scalar(v) for v in (beta, sx, sq))
    if static:
        static_scalars = (float(beta),
                          math.exp(-float(sx)),
                          math.exp(-float(sq)),
                          float(sx) + float(sq))
        kernel = functools.partial(_elementwise_kernel,
                                   static_scalars=static_scalars,
                                   compute_fixed=compute_fixed,
                                   compute_learned=compute_learned)
        index_map = lambda i: (i, 0)
        num_prefetch = 0
        operands = (lp2, lr2)
    else:
        kernel = functools.partial(_elementwise_kernel,
                                   static_scalars=None,
                                   compute_fixed=compute_fixed,
                                   compute_learned=compute_learned)
        index_map = lambda i, scalars: (i, 0)
        num_prefetch = 1
        beta_f = jnp.asarray(beta, jnp.float32)
        sx_f = jnp.asarray(sx, jnp.float32)
        sq_f = jnp.asarray(sq, jnp.float32)
        scalars = jnp.stack([beta_f, jnp.exp(-sx_f), jnp.exp(-sq_f),
                             sx_f + sq_f]).astype(jnp.float32)
        operands = (scalars, lp2, lr2)

    blk = pl.BlockSpec((tb, _LANES), index_map)
    one_out = jax.ShapeDtypeStruct((rows, _LANES), dtype)
    if n_out == 2:
        out_shape = (one_out, one_out)
        out_specs = [blk, blk]
    else:
        out_shape = one_out
        out_specs = blk

    result = pl.pallas_call(
        kernel,
        out_shape=out_shape,
        grid_spec=pltpu.PrefetchScalarGridSpec(
            num_scalar_prefetch=num_prefetch,
            grid=(grid_len,),
            in_specs=[blk, blk],
            out_specs=out_specs,
        ),
        compiler_params=pltpu.CompilerParams(
            dimension_semantics=("parallel",),
            vmem_limit_bytes=vmem_limit,
        ),
    )(*operands)

    outs = result if n_out == 2 else (result,)

    def _restore(y):
        if padded:
            return y.reshape(-1)[:total].reshape(orig_shape)
        return y.reshape(orig_shape)

    outs = tuple(_restore(o) for o in outs)
    return outs if n_out == 2 else outs[0]


# ---------------------------------------------------------------------------
# Reduction-fused kernel: sums loss_pos / loss_rot inside the kernel; the
# (cheap) scalar weighting is done in the wrapper.  ~2x less HBM traffic than
# writing two full-size elementwise outputs.
# ---------------------------------------------------------------------------
def _loss_sums_kernel(lpos_ref, lrot_ref, spos_ref, srot_ref,
                      accp_ref, accr_ref, *, total):
    i = pl.program_id(0)

    @pl.when(i == 0)
    def _():
        accp_ref[...] = jnp.zeros_like(accp_ref)
        accr_ref[...] = jnp.zeros_like(accr_ref)

    tb = lpos_ref.shape[0]
    row0 = i * tb
    row_iota = lax.broadcasted_iota(jnp.int32, (tb, _LANES), 0)
    lane_iota = lax.broadcasted_iota(jnp.int32, (tb, _LANES), 1)
    # Mask the 128-tail pad and the ragged last grid block in one comparison.
    valid = (row0 + row_iota) * _LANES + lane_iota < total

    lp = jnp.where(valid, lpos_ref[...].astype(jnp.float32), 0.0)
    lr = jnp.where(valid, lrot_ref[...].astype(jnp.float32), 0.0)

    accp_ref[...] += jnp.sum(lp, axis=0, keepdims=True)
    accr_ref[...] += jnp.sum(lr, axis=0, keepdims=True)

    @pl.when(i == pl.num_programs(0) - 1)
    def _():
        spos_ref[...] = accp_ref[...]
        srot_ref[...] = accr_ref[...]


def basenet_weighted_loss_sums(loss_pos, loss_rot, sx, sq, beta=1.0,
                               block_rows=None, mean=False):
    """Returns scalar (sum(fixed_weighting_loss), sum(learned_weighted_loss)),
    or the means if mean=True, without materializing the elementwise outputs.
    """
    assert loss_pos.shape == loss_rot.shape, "loss_pos / loss_rot shape mismatch"
    assert loss_pos.dtype == loss_rot.dtype, "loss_pos / loss_rot dtype mismatch"

    lp2, rows, total, _ = _to_rows_lanes(loss_pos)
    lr2, _, _, _ = _to_rows_lanes(loss_rot)
    itemsize = jnp.dtype(loss_pos.dtype).itemsize
    tb, grid_len, vmem_limit = _pick_block(rows, block_rows, itemsize, 2)

    blk = pl.BlockSpec((tb, _LANES), lambda i: (i, 0))
    out_blk = pl.BlockSpec((1, _LANES), lambda i: (0, 0))
    kernel = functools.partial(_loss_sums_kernel, total=total)

    spos, srot = pl.pallas_call(
        kernel,
        out_shape=(jax.ShapeDtypeStruct((1, _LANES), jnp.float32),
                   jax.ShapeDtypeStruct((1, _LANES), jnp.float32)),
        grid_spec=pltpu.PrefetchScalarGridSpec(
            num_scalar_prefetch=0,
            grid=(grid_len,),
            in_specs=[blk, blk],
            out_specs=[out_blk, out_blk],
            scratch_shapes=[pltpu.VMEM((1, _LANES), jnp.float32),
                            pltpu.VMEM((1, _LANES), jnp.float32)],
        ),
        compiler_params=pltpu.CompilerParams(
            dimension_semantics=("arbitrary",),   # sequential accumulation
            vmem_limit_bytes=vmem_limit,
        ),
    )(lp2, lr2)

    sum_pos = jnp.sum(spos)
    sum_rot = jnp.sum(srot)
    beta_f = jnp.asarray(beta, jnp.float32)
    sx_f = jnp.asarray(sx, jnp.float32)
    sq_f = jnp.asarray(sq, jnp.float32)

    fixed = sum_pos + beta_f * sum_rot
    learned = (jnp.exp(-sx_f) * sum_pos + jnp.exp(-sq_f) * sum_rot
               + total * (sx_f + sq_f))
    if mean:
        fixed = fixed / total
        learned = learned / total
    return fixed, learned


# ---------------------------------------------------------------------------
# Reference + self-test
# ---------------------------------------------------------------------------
def _ref_losses(loss_pos, loss_rot, sx, sq, beta=1.0):
    lp = loss_pos.astype(jnp.float32)
    lr = loss_rot.astype(jnp.float32)
    fixed = lp + beta * lr
    learned = jnp.exp(-sx) * lp + sx + jnp.exp(-sq) * lr + sq
    return fixed, learned


if __name__ == "__main__":
    key = jax.random.PRNGKey(0)
    k1, k2, k3, k4 = jax.random.split(key, 4)

    # Batch of 16 samples, 1024 per-sample loss components -> 128 x 128 lanes.
    B, N = 16, 1024
    loss_pos = jax.random.uniform(k1, (B, N), dtype=jnp.float32)
    loss_rot = jax.random.uniform(k2, (B, N), dtype=jnp.float32)

    sx, sq, beta = 0.3, -0.5, 1.0

    # 1) f32 elementwise, static scalars (baked into the kernel).
    fixed, learned = basenet_weighted_losses(loss_pos, loss_rot, sx, sq, beta)
    jax.block_until_ready((fixed, learned))
    fixed_ref, learned_ref = _ref_losses(loss_pos, loss_rot, sx, sq, beta)
    assert fixed.shape == loss_pos.shape and learned.shape == loss_pos.shape
    assert jnp.allclose(fixed, fixed_ref, atol=1e-5, rtol=1e-5)
    assert jnp.allclose(learned, learned_ref, atol=1e-5, rtol=1e-5)

    # 2) Single-output path with traced scalars (SMEM scalar-prefetch path).
    sx_dyn = jnp.asarray(sx, jnp.float32)
    sq_dyn = jnp.asarray(sq, jnp.float32)
    learned_only = basenet_weighted_losses(
        loss_pos, loss_rot, sx_dyn, sq_dyn, beta,
        compute_fixed=False, compute_learned=True)
    jax.block_until_ready(learned_only)
    assert jnp.allclose(learned_only, learned_ref, atol=1e-5, rtol=1e-5)

    # 3) bf16 path (native narrow dtype end-to-end; f32 math in-register).
    lp_bf16 = loss_pos.astype(jnp.bfloat16)
    lr_bf16 = loss_rot.astype(jnp.bfloat16)
    fixed_b, learned_b = basenet_weighted_losses(lp_bf16, lr_bf16, sx, sq, beta)
    jax.block_until_ready((fixed_b, learned_b))
    fixed_ref_b, learned_ref_b = _ref_losses(lp_bf16, lr_bf16, sx, sq, beta)
    assert fixed_b.dtype == jnp.bfloat16 and learned_b.dtype == jnp.bfloat16
    assert jnp.allclose(fixed_b.astype(jnp.float32), fixed_ref_b,
                        atol=2e-2, rtol=2e-2)
    assert jnp.allclose(learned_b.astype(jnp.float32), learned_ref_b,
                        atol=2e-2, rtol=2e-2)

    # 4) Ragged / non-multiple-of-128 shape (exercises tail pad + ragged block).
    lp_odd = jax.random.uniform(k3, (7, 300), dtype=jnp.float32)
    lr_odd = jax.random.uniform(k4, (7, 300), dtype=jnp.float32)
    fixed_o, learned_o = basenet_weighted_losses(lp_odd, lr_odd, sx, sq, beta)
    jax.block_until_ready((fixed_o, learned_o))
    fixed_ref_o, learned_ref_o = _ref_losses(lp_odd, lr_odd, sx, sq, beta)
    assert fixed_o.shape == lp_odd.shape
    assert jnp.allclose(fixed_o, fixed_ref_o, atol=1e-5, rtol=1e-5)
    assert jnp.allclose(learned_o, learned_ref_o, atol=1e-5, rtol=1e-5)

    # 5) Reduction-fused path: scalar sums vs. sums of the elementwise ref.
    fixed_sum, learned_sum = basenet_weighted_loss_sums(
        loss_pos, loss_rot, sx, sq, beta)
    jax.block_until_ready((fixed_sum, learned_sum))
    assert jnp.allclose(fixed_sum, jnp.sum(fixed_ref), rtol=1e-4, atol=1e-2)
    assert jnp.allclose(learned_sum, jnp.sum(learned_ref), rtol=1e-4, atol=1e-2)

    fixed_sum_o, learned_sum_o = basenet_weighted_loss_sums(
        lp_odd, lr_odd, sx, sq, beta)
    jax.block_until_ready((fixed_sum_o, learned_sum_o))
    assert jnp.allclose(fixed_sum_o, jnp.sum(fixed_ref_o), rtol=1e-4, atol=1e-2)
    assert jnp.allclose(learned_sum_o, jnp.sum(learned_ref_o),
                        rtol=1e-4, atol=1e-2)

    print("KERNEL_OK")
</pallas_src>

<mosaic_0001>
module attributes {stable_mosaic.version = 11 : i64} {
  func.func @_elementwise_kernel(%arg0: i32, %arg1: memref<64x128xf32, #tpu.memory_space<vmem>>, %arg2: memref<64x128xf32, #tpu.memory_space<vmem>>, %arg3: memref<64x128xf32, #tpu.memory_space<vmem>>, %arg4: memref<64x128xf32, #tpu.memory_space<vmem>>) attributes {dimension_semantics = [#tpu.dimension_semantics<parallel>], iteration_bounds = array<i64: 2>, scalar_prefetch = 0 : i64, scratch_operands = 0 : i64, tpu.core_type = #tpu.core_type<tc>, window_params = [{transform_indices = @transform_0, window_bounds = array<i64: 64, 128>}, {transform_indices = @transform_1, window_bounds = array<i64: 64, 128>}, {transform_indices = @transform_2, window_bounds = array<i64: 64, 128>}, {transform_indices = @transform_3, window_bounds = array<i64: 64, 128>}]} {
    %c0 = arith.constant 0 : index
    %c0_0 = arith.constant 0 : index
    %0 = vector.load %arg1[%c0, %c0_0] : memref<64x128xf32, #tpu.memory_space<vmem>>, vector<64x128xf32>
    %c0_1 = arith.constant 0 : index
    %c0_2 = arith.constant 0 : index
    %1 = vector.load %arg2[%c0_1, %c0_2] : memref<64x128xf32, #tpu.memory_space<vmem>>, vector<64x128xf32>
    %cst = arith.constant 1.000000e+00 : f32
    %2 = vector.broadcast %cst : f32 to vector<64x128xf32>
    %3 = arith.mulf %2, %1 : vector<64x128xf32>
    %4 = arith.addf %0, %3 : vector<64x128xf32>
    %c0_3 = arith.constant 0 : index
    %c0_4 = arith.constant 0 : index
    %5 = vector.load %arg3[%c0_3, %c0_4] : memref<64x128xf32, #tpu.memory_space<vmem>>, vector<64x128xf32>
    tpu.vector_store %arg3[%c0_3, %c0_4], %4 {strides = array<i32>} : memref<64x128xf32, #tpu.memory_space<vmem>>, vector<64x128xf32>,
    %cst_5 = arith.constant 0.740818202 : f32
    %6 = vector.broadcast %cst_5 : f32 to vector<64x128xf32>
    %7 = arith.mulf %6, %0 : vector<64x128xf32>
    %cst_6 = arith.constant 1.64872122 : f32
    %8 = vector.broadcast %cst_6 : f32 to vector<64x128xf32>
    %9 = arith.mulf %8, %1 : vector<64x128xf32>
    %10 = arith.addf %7, %9 : vector<64x128xf32>
    %cst_7 = arith.constant -2.000000e-01 : f32
    %11 = vector.broadcast %cst_7 : f32 to vector<64x128xf32>
    %12 = arith.addf %10, %11 : vector<64x128xf32>
    %c0_8 = arith.constant 0 : index
    %c0_9 = arith.constant 0 : index
    %13 = vector.load %arg4[%c0_8, %c0_9] : memref<64x128xf32, #tpu.memory_space<vmem>>, vector<64x128xf32>
    tpu.vector_store %arg4[%c0_8, %c0_9], %12 {strides = array<i32>} : memref<64x128xf32, #tpu.memory_space<vmem>>, vector<64x128xf32>,
    return
  }
  func.func @transform_0(%arg0: i32) -> (i32, i32) {
    %c0_i32 = arith.constant 0 : i32
    %c0_i32_0 = arith.constant 0 : i32
    return %arg0, %c0_i32 : i32, i32
  }
  func.func @transform_1(%arg0: i32) -> (i32, i32) {
    %c0_i32 = arith.constant 0 : i32
    %c0_i32_0 = arith.constant 0 : i32
    return %arg0, %c0_i32 : i32, i32
  }
  func.func @transform_2(%arg0: i32) -> (i32, i32) {
    %c0_i32 = arith.constant 0 : i32
    %c0_i32_0 = arith.constant 0 : i32
    return %arg0, %c0_i32 : i32, i32
  }
  func.func @transform_3(%arg0: i32) -> (i32, i32) {
    %c0_i32 = arith.constant 0 : i32
    %c0_i32_0 = arith.constant 0 : i32
    return %arg0, %c0_i32 : i32, i32
  }
}

</mosaic_0001>

<bundles_post_ra>
// kernel: tpu_custom_call.1
= control target key start
LH: loop header
LB: loop body
LE: loop exit
PB: predicated region body
PF: predicated region fallthrough
CT: control target
= control target key end

     0   :  { %9 = vsyncpa [#allocation3], 0  ;;  %s1051_s0 = inlined_call_operand.hbm [shape: f32[128,128], index: 0, kind: input, shape index: {}]   ;;  %s1052_s1 = inlined_call_operand.hbm [shape: f32[128,128], index: 1, kind: input, shape index: {}]   ;;  %s1053_s2 = inlined_call_operand.hbm [shape: f32[128,128], index: 2, kind: output, shape index: {0}]   ;;  %s1054_s3 = inlined_call_operand.hbm [shape: f32[128,128], index: 3, kind: output, shape index: {1}]  }
   0x1   :  { %11 = vsyncpa [#allocation3 + $0x1], 0 }
   0x2   :  { %12 = vsyncpa [#allocation6], 0 }
   0x3   :  { %14 = vsyncpa [#allocation6 + $0x1], 0 }
   0x4   :  { %15 = vsyncpa [#allocation4], 0 }
   0x5   :  { %17 = vsyncpa [#allocation4 + $0x1], 0 }
   0x6   :  { %18 = vsyncpa [#allocation9], 0 }
   0x7   :  { %20 = vsyncpa [#allocation9 + $0x1], 0  ;;  %s749_s12 = smov 0   ;;  %s751_s13 = smov 0  }
   0x8   :  { %s753_s14 = smov 0   ;;  %s755_s15 = smov 0  }
   0x9 LB: > { %s770_s16 = sadd.s32 4294967295, %s719_s15   ;;  %s479_s17 = sadd.s32 4294967294, %s719_s15   ;;  %s719_s15 = sphi %s755_s15, %s1070_s15   ;;  %s715_s14 = sphi %s753_s14, %s1069_s14   ;;  %s711_s13 = sphi %s751_s13, %s1068_s13   ;;  %s707_s12 = sphi %s749_s12, %s1067_s12  }
   0xa   : > { %s774_s18 = sadd.s32 1, %s719_s15   ;;  %s33_s19 = sadd.s32 1, %s715_s14 }
   0xb   : > { %s30_s20 = ssub.s32 %s719_s15, %s774_s18  ;;  %p40_p0 = scmp.ne.s32.totalorder %s715_s14, %s711_s13 }
   0xc   : > { %p31_p1 = scmp.eq.s32.totalorder %s30_s20, 0  ;;  %p41_p2 = scmp.eq.s32.totalorder %s719_s15, 0 }
   0xd   : > { %p46_p3 = scmp.ne.s32.totalorder %s711_s13, %s707_s12  ;;  %p47_p4 = scmp.eq.s32.totalorder %s770_s16, 0 }
   0xe   : > { %s786_s21 = scalar_select %p31_p1, %s715_s14, %s33_s19  }
   0xf   : > { %p788_p5 = por %p41_p2, %p40_p0  ;;  %p792_p6 = por %p47_p4, %p46_p3 }
  0x10   : > { %p96_p7 = scmp.eq.s32.totalorder %s770_s16, 1  ;;  %p102_p8 = scmp.eq.s32.totalorder %s479_s17, 1 }
  0x11   : > { %s1058_s23 = scalar_select %p792_p6, 1, 0 }
  0x12   : > { %p527_p10 = scmp.lt.s32.totalorder %s719_s15, 2  ;;  %p799_p11 = por %p96_p7, %p40_p0 }
  0x13   : > { %p803_p12 = por %p102_p8, %p46_p3  ;;  %s808_s26 = sand.u32 1, %s715_s14  }
  0x14   : > { %s1059_s24 = scalar_select %p799_p11, 1, 0 }
  0x15   : > { %s1060_s25 = scalar_select %p803_p12, 1, 0 }
  0x16   : > { %s501_s27 = sshll.u32 %s719_s15, 10  ;;  %s482_s28 = sshll.u32 %s808_s26, 6 }
  0x17   : > { %s817_s4 = scalar_lea.hbm %s1051_s0, %s501_s27  ;;  %s152_s5 = scalar_lea.vmem [#allocation2], %s482_s28 }
  0x18   : > { %s159_s6 = sshll.u32 %s152_s5, 4  ;;  %p823_p13 = pnand %p527_p10, %p788_p5  ;;  %s827_s6 = int_to_ptr.vmem [resolvable:$true] %s159_s6 }
  0x19   : > { %s149_s8 = scalar_lea.sflag [#allocation3], %s808_s26  ;;  %s565_s9 = scalar_lea.hbm %s817_s4, 1024 }
  0x1a   : > { %p566_p0 = scmp.ne.s32.totalorder %s817_s4, %s565_s9  ;;  %p567_p1 = pneg %p823_p13 }
  0x1b   : > { %s570_s17 = scalar_lea.hbm %s1051_s0, 2048  ;;  %p571_p4 = scmp.lt.s32.totalorder %s817_s4, %s1051_s0 }
  0x1c   : > { %p568_p2 = pnand %p567_p1, %p566_p0  ;;  %p572_p5 = scmp.lt.s32.totalorder %s570_s17, %s565_s9 }
  0x1e   : > { %p569_p3 = pneg %p568_p2  ;;  %p573_p7 = por %p572_p5, %p571_p4 }
  0x20   : > { %p574_p8 = pnand %p573_p7, %p569_p3 }
  0x22   : > { %577 = shalt.err (!%p574_p8)
}
  0x23   : > { %s578_s22 = scalar_lea.vmem %s827_s6, 1024  ;;  %s721_s29 = smov [#allocation2]  }
  0x24   : > { %p579_p10 = scmp.ne.s32.totalorder %s827_s6, %s578_s22  ;;  %s583_s30 = sshll.u32 %s721_s29, 4  ;;  %s584_s30 = int_to_ptr.vmem [resolvable:$false] %s583_s30 }
  0x25   : > { %s585_s5 = scalar_lea.vmem %s584_s30, 2048  ;;  %p586_p9 = scmp.lt.s32.totalorder %s827_s6, %s584_s30 }
  0x26   : > { %p581_p0 = pnand %p579_p10, %p567_p1  ;;  %p587_p12 = scmp.lt.s32.totalorder %s585_s5, %s578_s22 }
  0x28   : > { %p582_p2 = pneg %p581_p0  ;;  %p588_p11 = por %p587_p12, %p586_p9 }
  0x2a   : > { %p589_p4 = pnand %p588_p11, %p582_p2 }
  0x2c   : > { %592 = shalt.err (!%p589_p4)
}
  0x2d   : > { %s722_s9 = smov 128   ;;  %s723_s10 = smov 8  }
  0x2e   : > { %516 = dma.hbm_to_vmem [thread:$0]  (!%p823_p13), %s817_s4, 1024, %s827_s6, %s149_s8, %s722_s9, %s722_s9, %s723_s10  }
  0x2f   : > { %p488_p9 = scmp.ge.s32.totalorder %s719_s15, 1  ;;  %p188_p11 = scmp.lt.s32.totalorder %s719_s15, 3 }
  0x30   : > { %s870_s20 = scalar_lea.hbm %s1052_s1, %s501_s27  ;;  %s173_s22 = scalar_lea.vmem [#allocation5], %s482_s28 }
  0x31   : > { %p861_p12 = pnand %p488_p9, %p188_p11  ;;  %s180_s29 = sshll.u32 %s173_s22, 4  ;;  %s874_s29 = int_to_ptr.vmem [resolvable:$true] %s180_s29 }
  0x32   : > { %s170_s4 = scalar_lea.sflag [#allocation6], %s808_s26  ;;  %s593_s6 = scalar_lea.hbm %s870_s20, 1024 }
  0x33   : > { %p594_p3 = scmp.ne.s32.totalorder %s870_s20, %s593_s6  ;;  %s598_s27 = scalar_lea.hbm %s1052_s1, 2048 }
  0x34   : > { %p599_p8 = scmp.lt.s32.totalorder %s870_s20, %s1052_s1  ;;  %p600_p10 = scmp.lt.s32.totalorder %s598_s27, %s593_s6 }
  0x35   : > { %p596_p5 = pnand %p594_p3, %p567_p1 }
  0x36   : > { %p601_p0 = por %p600_p10, %p599_p8 }
  0x37   : > { %p597_p7 = pneg %p596_p5 }
  0x39   : > { %p602_p2 = pnand %p601_p0, %p597_p7 }
  0x3b   : > { %605 = shalt.err (!%p602_p2)
}
  0x3c   : > { %s606_s26 = scalar_lea.vmem %s874_s29, 1024  ;;  %s724_s28 = smov [#allocation5]  }
  0x3d   : > { %p607_p4 = scmp.ne.s32.totalorder %s874_s29, %s606_s26  ;;  %s611_s19 = sshll.u32 %s724_s28, 4  ;;  %s612_s19 = int_to_ptr.vmem [resolvable:$false] %s611_s19 }
  0x3e   : > { %s613_s22 = scalar_lea.vmem %s612_s19, 2048  ;;  %p614_p3 = scmp.lt.s32.totalorder %s874_s29, %s612_s19 }
  0x3f   : > { %p609_p9 = pnand %p607_p4, %p567_p1  ;;  %p615_p5 = scmp.lt.s32.totalorder %s613_s22, %s606_s26 }
  0x41   : > { %p610_p11 = pneg %p609_p9  ;;  %p616_p6 = por %p615_p5, %p614_p3 }
  0x43   : > { %p617_p8 = pnand %p616_p6, %p610_p11 }
  0x45   : > { %620 = shalt.err (!%p617_p8)
}
  0x46   : > { %519 = dma.hbm_to_vmem [thread:$0]  (!%p823_p13), %s870_s20, 1024, %s874_s29, %s170_s4, %s722_s9, %s722_s9, %s723_s10  }
  0x47   : > { %192 = sbr.rel (%p861_p12) target bundleno = 135 (0x87), region = 28  ;;  %s905_s6 = sand.u32 (!%p861_p12), 1, %s711_s13  }
  0x48   : > { %s489_s8 = sshll.u32 (!%p861_p12), %s905_s6, 6  ;;  %s195_s30 = scalar_lea.sflag (!%p861_p12), [#allocation3], %s905_s6 }
  0x49   : > { %s909_s27 = scalar_lea.vmem (!%p861_p12), [#allocation2], %s489_s8  ;;  %p1063_p6 = scmp.ne.s32.totalorder (!%p861_p12), %s1058_s23, 0 }
  0x4c   : > { %690 = dma.done.wait (%p1063_p6), %s195_s30, 1024  }
  0x4d   : > { %692 = vsyncadd (%p1063_p6), %s195_s30, 4294966272  ;;  %s204_s7 = scalar_lea.sflag [#allocation6], %s905_s6  ;;  %s916_s9 = scalar_lea.vmem [#allocation5], %s489_s8 }
  0x4e   : > { %694 = dma.done.wait (%p1063_p6), %s204_s7, 1024  }
  0x4f   : > { %696 = vsyncadd (%p1063_p6), %s204_s7, 4294966272  ;;  %s922_s10 = scalar_lea.vmem [#allocation7], %s489_s8  ;;  %s925_s20 = scalar_lea.vmem [#allocation8], %s489_s8  ;;  %v244_v0 = vld [vmem:[%s909_s27] sm:$0xff]  ;;  %v245_v2 = vld [vmem:[%s909_s27 + $0x8] sm:$0xff] }
  0x50   : > { %s335_s11 = sshll.u32 %s922_s10, 4  ;;  %s351_s29 = sshll.u32 %s925_s20, 4  ;;  %v252_v1 = vld [vmem:[%s916_s9] sm:$0xff]  ;;  %v276_v4 = vmul.f32 0.7408182, %v244_v0  ;;  %v253_v6 = vld [vmem:[%s916_s9 + $0x8] sm:$0xff]  ;;  %s952_s11 = int_to_ptr.vmem [resolvable:$true] %s335_s11  ;;  %s967_s29 = int_to_ptr.vmem [resolvable:$true] %s351_s29 }
  0x51   : > { %s503_s23 = sshll.u32 %s770_s16, 10  ;;  %v260_v3 = vadd.f32 %v252_v1, %v244_v0  ;;  %v284_v5 = vmul.f32 1.6487212, %v252_v1  ;;  %v246_v7 = vld [vmem:[%s909_s27 + $0x10] sm:$0xff]  ;;  %v261_v8 = vadd.f32 %v253_v6, %v245_v2  ;;  %v277_v9 = vmul.f32 0.7408182, %v245_v2 }
  0x52   : > { %v285_v10 = vmul.f32 1.6487212, %v253_v6  ;;  %v254_v11 = vld [vmem:[%s916_s9 + $0x10] sm:$0xff]  ;;  %v247_v12 = vld [vmem:[%s909_s27 + $0x18] sm:$0xff]  ;;  %v278_v14 = vmul.f32 0.7408182, %v246_v7  ;;  %s960_s17 = scalar_lea.hbm %s1053_s2, %s503_s23 }
  0x53   : > { %268 = vst [vmem:[%s922_s10] sm:$0xff] %v260_v3  ;;  %v262_v13 = vadd.f32 %v254_v11, %v246_v7  ;;  %v286_v15 = vmul.f32 1.6487212, %v254_v11  ;;  %v255_v16 = vld [vmem:[%s916_s9 + $0x18] sm:$0xff]  ;;  %v248_v17 = vld [vmem:[%s909_s27 + $0x20] sm:$0xff]  ;;  %v292_v18 = vadd.f32 %v284_v5, %v276_v4  ;;  %269 = vst [vmem:[%s922_s10 + $0x8] sm:$0xff] %v261_v8  ;;  %s317_s26 = scalar_lea.sflag [#allocation4], %s905_s6 }
  0x54   : > { %v263_v19 = vadd.f32 %v255_v16, %v247_v12  ;;  %v279_v20 = vmul.f32 0.7408182, %v247_v12  ;;  %v287_v21 = vmul.f32 1.6487212, %v255_v16  ;;  %v256_v22 = vld [vmem:[%s916_s9 + $0x20] sm:$0xff]  ;;  %v249_v23 = vld [vmem:[%s909_s27 + $0x28] sm:$0xff]  ;;  %v293_v24 = vadd.f32 %v285_v10, %v277_v9 }
  0x55   : > { %270 = vst [vmem:[%s922_s10 + $0x10] sm:$0xff] %v262_v13  ;;  %v264_v25 = vadd.f32 %v256_v22, %v248_v17  ;;  %v280_v26 = vmul.f32 0.7408182, %v248_v17  ;;  %v288_v27 = vmul.f32 1.6487212, %v256_v22  ;;  %v257_v28 = vld [vmem:[%s916_s9 + $0x28] sm:$0xff]  ;;  %v294_v30 = vadd.f32 %v286_v15, %v278_v14 }
  0x56   : > { %v250_v29 = vld [vmem:[%s909_s27 + $0x30] sm:$0xff]  ;;  %271 = vst [vmem:[%s922_s10 + $0x18] sm:$0xff] %v263_v19  ;;  %v265_v31 = vadd.f32 %v257_v28, %v249_v23  ;;  %v281_v32 = vmul.f32 0.7408182, %v249_v23  ;;  %v289_v33 = vmul.f32 1.6487212, %v257_v28  ;;  %v295_v36 = vadd.f32 %v287_v21, %v279_v20 }
  0x57   : > { %v258_v34 = vld [vmem:[%s916_s9 + $0x30] sm:$0xff]  ;;  %v251_v35 = vld [vmem:[%s909_s27 + $0x38] sm:$0xff]  ;;  %272 = vst [vmem:[%s922_s10 + $0x20] sm:$0xff] %v264_v25  ;;  %v282_v38 = vmul.f32 0.7408182, %v250_v29  ;;  %v296_v41 = vadd.f32 %v288_v27, %v280_v26  ;;  %s621_s28 = scalar_lea.vmem %s952_s11, 1024 }
  0x58   : > { %v266_v37 = vadd.f32 %v258_v34, %v250_v29  ;;  %v290_v39 = vmul.f32 1.6487212, %v258_v34  ;;  %v259_v40 = vld [vmem:[%s916_s9 + $0x38] sm:$0xff]  ;;  %273 = vst [vmem:[%s922_s10 + $0x28] sm:$0xff] %v265_v31  ;;  %v283_v43 = vmul.f32 0.7408182, %v251_v35  ;;  %v297_v49 = vadd.f32 %v289_v33, %v281_v32  ;;  %p622_p13 = scmp.ne.s32.totalorder %s952_s11, %s621_s28 }
  0x59   : > { %v267_v42 = vadd.f32 %v259_v40, %v251_v35  ;;  %v291_v44 = vmul.f32 1.6487212, %v259_v40  ;;  %v300_v45 = vadd.f32 -0.2, %v292_v18  ;;  %v301_v46 = vadd.f32 -0.2, %v293_v24 }
  0x5a   : > { %274 = vst [vmem:[%s922_s10 + $0x30] sm:$0xff] %v266_v37  ;;  %v302_v47 = vadd.f32 -0.2, %v294_v30  ;;  %v303_v48 = vadd.f32 -0.2, %v295_v36  ;;  %v298_v51 = vadd.f32 %v290_v39, %v282_v38  ;;  %p1064_p1 = scmp.ne.s32.totalorder %s1059_s24, 0 }
  0x5b   : > { %275 = vst [vmem:[%s922_s10 + $0x38] sm:$0xff] %v267_v42  ;;  %308 = vst [vmem:[%s925_s20] sm:$0xff] %v300_v45  ;;  %v304_v50 = vadd.f32 -0.2, %v296_v41  ;;  %v299_v52 = vadd.f32 %v291_v44, %v283_v43  ;;  %v305_v53 = vadd.f32 -0.2, %v297_v49  ;;  %s725_s19 = smov [#allocation7]  }
  0x5c   : > { %309 = vst [vmem:[%s925_s20 + $0x8] sm:$0xff] %v301_v46  ;;  %310 = vst [vmem:[%s925_s20 + $0x10] sm:$0xff] %v302_v47  ;;  %p623_p12 = pnand %p622_p13, %p1064_p1  ;;  %s625_s22 = sshll.u32 %s725_s19, 4  ;;  %s626_s22 = int_to_ptr.vmem [resolvable:$false] %s625_s22 }
  0x5d   : > { %311 = vst [vmem:[%s925_s20 + $0x18] sm:$0xff] %v303_v48  ;;  %s627_s8 = scalar_lea.vmem %s626_s22, 2048  ;;  %p628_p10 = scmp.lt.s32.totalorder %s952_s11, %s626_s22 }
  0x5e   : > { %p624_p7 = pneg %p623_p12  ;;  %p629_p0 = scmp.lt.s32.totalorder %s627_s8, %s621_s28 }
  0x60   : > { %p630_p2 = por %p629_p0, %p628_p10 }
  0x62   : > { %p631_p4 = pnand %p630_p2, %p624_p7 }
  0x64   : > { %634 = shalt.err (!%p631_p4)
}
  0x65   : > { %s635_s30 = scalar_lea.hbm %s960_s17, 1024  ;;  %s639_s9 = scalar_lea.hbm %s1053_s2, 2048 }
  0x66   : > { %p636_p9 = scmp.ne.s32.totalorder %s960_s17, %s635_s30  ;;  %p640_p5 = scmp.lt.s32.totalorder %s960_s17, %s1053_s2 }
  0x67   : > { %p641_p8 = scmp.lt.s32.totalorder %s639_s9, %s635_s30 }
  0x68   : > { %p637_p11 = pnand %p636_p9, %p1064_p1 }
  0x69   : > { %p642_p6 = por %p641_p8, %p640_p5 }
  0x6a   : > { %p638_p3 = pneg %p637_p11 }
  0x6c   : > { %p643_p13 = pnand %p642_p6, %p638_p3 }
  0x6e   : > { %646 = shalt.err (!%p643_p13)
}
  0x6f   : > { %s726_s5 = smov 128   ;;  %s727_s28 = smov 8   ;;  %312 = vst [vmem:[%s925_s20 + $0x20] sm:$0xff] %v304_v50  ;;  %v306_v54 = vadd.f32 -0.2, %v298_v51  ;;  %313 = vst [vmem:[%s925_s20 + $0x28] sm:$0xff] %v305_v53 }
  0x70   : > { %509 = dma.vmem_to_hbm [thread:$0]  (%p1064_p1), %s952_s11, 1024, %s960_s17, %s317_s26, %s726_s5, %s726_s5, %s727_s28   ;;  %v307_v55 = vadd.f32 -0.2, %v299_v52 }
  0x71   : > { %s1004_s8 = scalar_lea.hbm %s1054_s3, %s503_s23  ;;  %314 = vst [vmem:[%s925_s20 + $0x30] sm:$0xff] %v306_v54  ;;  %s322_s30 = scalar_lea.sflag [#allocation9], %s905_s6 }
  0x72   : > { %315 = vst [vmem:[%s925_s20 + $0x38] sm:$0xff] %v307_v55  ;;  %s647_s27 = scalar_lea.vmem %s967_s29, 1024  ;;  %s728_s11 = smov [#allocation8]  }
  0x73   : > { %p648_p12 = scmp.ne.s32.totalorder %s967_s29, %s647_s27  ;;  %s651_s17 = sshll.u32 %s728_s11, 4  ;;  %s652_s17 = int_to_ptr.vmem [resolvable:$false] %s651_s17 }
  0x74   : > { %s653_s26 = scalar_lea.vmem %s652_s17, 2048  ;;  %p654_p0 = scmp.lt.s32.totalorder %s967_s29, %s652_s17 }
  0x75   : > { %p649_p7 = pnand %p648_p12, %p1064_p1  ;;  %p655_p2 = scmp.lt.s32.totalorder %s653_s26, %s647_s27 }
  0x77   : > { %p650_p10 = pneg %p649_p7  ;;  %p656_p4 = por %p655_p2, %p654_p0 }
  0x79   : > { %p657_p9 = pnand %p656_p4, %p650_p10 }
  0x7b   : > { %660 = shalt.err (!%p657_p9)
}
  0x7c   : > { %s661_s16 = scalar_lea.hbm %s1004_s8, 1024  ;;  %s665_s23 = scalar_lea.hbm %s1054_s3, 2048 }
  0x7d   : > { %p662_p11 = scmp.ne.s32.totalorder %s1004_s8, %s661_s16  ;;  %p666_p8 = scmp.lt.s32.totalorder %s1004_s8, %s1054_s3 }
  0x7e   : > { %p667_p6 = scmp.lt.s32.totalorder %s665_s23, %s661_s16 }
  0x7f   : > { %p663_p3 = pnand %p662_p11, %p1064_p1 }
  0x80   : > { %p668_p13 = por %p667_p6, %p666_p8 }
  0x81   : > { %p664_p5 = pneg %p663_p3 }
  0x83   : > { %p669_p12 = pnand %p668_p13, %p664_p5 }
  0x85   : > { %672 = shalt.err (!%p669_p12)
}
  0x86   : > { %510 = dma.vmem_to_hbm [thread:$0]  (%p1064_p1), %s967_s29, 1024, %s1004_s8, %s322_s30, %s726_s5, %s726_s5, %s727_s28  }
  0x87 PF: > { %s366_s10 = sand.u32 1, %s707_s12   ;;  %p1065_p7 = scmp.ne.s32.totalorder %s1060_s25, 0 }
  0x88   : > { %p1066_p10 = scmp.ge.s32.totalorder %s719_s15, 2  ;;  %s367_s4 = scalar_lea.sflag [#allocation4], %s366_s10 }
  0x8a   : > { %p521_p0 = pnand %p1066_p10, %p1065_p7 }
  0x8c   : > { %p522_p2 = pneg %p521_p0 }
  0x8e   : > { %698 = dma.done.wait (%p522_p2), %s367_s4, 1024  }
  0x8f   : > { %700 = vsyncadd (%p522_p2), %s367_s4, 4294966272  ;;  %s376_s19 = scalar_lea.sflag [#allocation9], %s366_s10 }
  0x90   : > { %702 = dma.done.wait (%p522_p2), %s376_s19, 1024  }
  0x91   : > { %704 = vsyncadd (%p522_p2), %s376_s19, 4294966272  ;;  %p23_p1 = scmp.ge.s32.totalorder %s774_s18, 4   ;;  %s1067_s12 = smov %s711_s13 }
  0x92   : > { %s1068_s13 = smov %s715_s14  ;;  %s1069_s14 = smov %s786_s21 }
  0x93   : > { %s1070_s15 = smov %s774_s18  ;;  %25 = sbr.rel (!%p23_p1) target bundleno = 9 (0x9), region = 103 }
  0x98   :  { %381 = vsyncpa [#allocation3], 1 }
  0x99   :  { %383 = vsyncpa [#allocation3 + $0x1], 1 }
  0x9a   :  { %384 = vsyncpa [#allocation6], 1 }
  0x9b   :  { %386 = vsyncpa [#allocation6 + $0x1], 1 }
  0x9c   :  { %387 = vsyncpa [#allocation4], 1 }
  0x9d   :  { %389 = vsyncpa [#allocation4 + $0x1], 1 }
  0x9e   :  { %390 = vsyncpa [#allocation9], 1 }
  0x9f   :  { %392 = vsyncpa [#allocation9 + $0x1], 1 }

</bundles_post_ra>
